<compile_context>
chip_gen: v5e
topology: v5e:2x2
jax: 0.10.0
libtpu: 0.0.40
codegen_flags: <defaults>
</compile_context>

<pallas_src>
import functools

import jax
import jax.numpy as jnp
from jax.experimental import pallas as pl
from jax.experimental.pallas import tpu as pltpu


def _raster_kernel(vert_ref, row_ref, col_ref, out_ref, *, k, inv_scale):
    # vert_ref: (TB, 4k) packed per-polygon edge data:
    #           cols [0:k)=vr, [k:2k)=vrp, [2k:3k)=vc, [3k:4k)=slope
    # row_ref / col_ref: (1, PT) float row / col coordinate of each flattened
    #                    pixel in this tile (precomputed mesh, like the module).
    # out_ref:  (TB, PT) flattened rasterization for TB polygons.
    tb, pt = out_ref.shape

    rr = row_ref[...]                      # (1, PT)
    cc = col_ref[...]                      # (1, PT)

    dist = jnp.zeros((tb, pt), jnp.float32)
    inside = jnp.zeros((tb, pt), jnp.bool_)

    # k is small and static -> fully unrolled edge loop; working set stays at a
    # handful of (TB, PT) slabs.
    for j in range(k):
        vr = vert_ref[:, j:j + 1]                      # (TB, 1)
        vrp = vert_ref[:, k + j:k + j + 1]
        vc = vert_ref[:, 2 * k + j:2 * k + j + 1]
        slope = vert_ref[:, 3 * k + j:3 * k + j + 1]   # (vcp - vc)/(vrp - vr)

        # --- distance term: accumulate ||v_j - (r, c)|| ----------------------
        dr = vr - rr
        dc = vc - cc
        dist = dist + jnp.sqrt(dr * dr + dc * dc)

        # --- even-odd crossing test (parity accumulated as boolean XOR) ------
        straddles = (vr > rr) != (vrp > rr)            # edge straddles this row
        x_int = slope * (rr - vr) + vc                 # no per-pixel divide
        inside = inside ^ (straddles & (cc < x_int))

    c_sign = jnp.where(inside, 1.0, -1.0)
    out_ref[...] = jax.nn.sigmoid(c_sign * dist * inv_scale)


def differentiable_rasterization(polygons, *, size, tau=2.0, tb=8):
    """polygons: (b, n, k, 2) float, normalized coords in [0, 1]."""
    b, n, k, _ = polygons.shape
    bn = b * n
    num_pixels = size * size

    # ---- wrapper glue (cheap, O(bn*k)) --------------------------------------
    # roll (x, y) -> (y, x), scale by image size; split current/previous verts;
    # precompute the per-edge slope with the degenerate-edge guard (the guard
    # value is irrelevant: straddles==False masks horizontal edges).
    poly = jnp.roll(polygons.astype(jnp.float32), 1, axis=-1) * size
    poly = poly.reshape(bn, k, 2)
    vr = poly[:, :, 0]                               # rows
    vc = poly[:, :, 1]                               # cols
    vrp = jnp.roll(vr, 1, axis=1)                    # previous vertex (wrap)
    vcp = jnp.roll(vc, 1, axis=1)
    denom = vrp - vr
    slope = (vcp - vc) / jnp.where(denom == 0.0, 1.0, denom)
    verts = jnp.concatenate([vr, vrp, vc, slope], axis=1)        # (bn, 4k)

    # Pad the polygon axis to a multiple of TB (degenerate all-zero polygons;
    # their output rows are sliced off below).
    bn_pad = ((bn + tb - 1) // tb) * tb
    if bn_pad != bn:
        verts = jnp.pad(verts, ((0, bn_pad - bn), (0, 0)))

    # Precomputed flattened mesh (rows / cols), same as the module's self.mesh.
    pix = jnp.arange(num_pixels, dtype=jnp.int32)
    row_map = (pix // size).astype(jnp.float32).reshape(1, num_pixels)
    col_map = (pix % size).astype(jnp.float32).reshape(1, num_pixels)

    # Pixel tile: whole image if small, else the largest 128-multiple divisor
    # under the cap (keeps per-step VMEM slabs small; relevant for v7x 64 MiB).
    max_tile = 16384
    if num_pixels <= max_tile:
        pt = num_pixels
    else:
        pt = num_pixels
        cand = (max_tile // 128) * 128
        while cand >= 128:
            if num_pixels % cand == 0:
                pt = cand
                break
            cand -= 128

    grid = (bn_pad // tb, num_pixels // pt)

    out = pl.pallas_call(
        functools.partial(_raster_kernel, k=k, inv_scale=1.0 / (tau * size)),
        out_shape=jax.ShapeDtypeStruct((bn_pad, num_pixels), jnp.float32),
        grid=grid,
        in_specs=[
            pl.BlockSpec((tb, 4 * k), lambda i, t: (i, 0)),     # packed verts
            pl.BlockSpec((1, pt), lambda i, t: (0, t)),         # row coords
            pl.BlockSpec((1, pt), lambda i, t: (0, t)),         # col coords
        ],
        out_specs=pl.BlockSpec((tb, pt), lambda i, t: (i, t)),
        compiler_params=pltpu.CompilerParams(
            dimension_semantics=("parallel", "parallel")),
    )(verts, row_map, col_map)

    return out[:bn].reshape(b, n, size, size)


def _reference(polygons, *, size, tau=2.0):
    """Pure-JAX reference mirroring the PyTorch forward (C generalized per polygon)."""
    b, n, k, _ = polygons.shape
    poly = jnp.roll(polygons.astype(jnp.float32), 1, axis=-1) * size
    poly = poly.reshape(b * n, k, 2)

    p = jnp.arange(size * size)
    mesh = jnp.stack([p // size, p % size], axis=-1).astype(jnp.float32)   # (P, 2)
    diff = poly[:, None, :, :] - mesh[None, :, None, :]                    # (bn,P,k,2)
    d = jnp.linalg.norm(diff, axis=-1).sum(-1).reshape(b, n, size, size)

    vr, vc = poly[:, :, 0], poly[:, :, 1]
    vrp, vcp = jnp.roll(vr, 1, axis=1), jnp.roll(vc, 1, axis=1)
    denom = vrp - vr
    slope = (vcp - vc) / jnp.where(denom == 0.0, 1.0, denom)
    rr = (p // size).astype(jnp.float32)[None, :, None]
    cc = (p % size).astype(jnp.float32)[None, :, None]
    vr_, vrp_, vc_ = vr[:, None, :], vrp[:, None, :], vc[:, None, :]
    cond_y = (vr_ > rr) != (vrp_ > rr)
    x_int = slope[:, None, :] * (rr - vr_) + vc_
    crossings = jnp.sum(cond_y & (cc < x_int), axis=-1)
    c_sign = jnp.where((crossings % 2) == 1, 1.0, -1.0).reshape(b, n, size, size)
    return jax.nn.sigmoid(c_sign * d / (tau * size))


if __name__ == "__main__":
    b, n, k, size, tau = 2, 2, 6, 16, 2.0
    key = jax.random.PRNGKey(0)
    polygons = jax.random.uniform(key, (b, n, k, 2), dtype=jnp.float32)

    out = differentiable_rasterization(polygons, size=size, tau=tau)
    out = jax.block_until_ready(out)

    assert out.shape == (b, n, size, size), out.shape
    ref = jax.block_until_ready(_reference(polygons, size=size, tau=tau))
    assert jnp.allclose(out, ref, atol=1e-5, rtol=1e-4), float(
        jnp.max(jnp.abs(out - ref))
    )
    print("KERNEL_OK")
</pallas_src>

<mosaic_0001>
module attributes {stable_mosaic.version = 11 : i64} {
  func.func @_raster_kernel(%arg0: i32, %arg1: i32, %arg2: memref<8x24xf32, #tpu.memory_space<vmem>>, %arg3: memref<1x256xf32, #tpu.memory_space<vmem>>, %arg4: memref<1x256xf32, #tpu.memory_space<vmem>>, %arg5: memref<8x256xf32, #tpu.memory_space<vmem>>) attributes {dimension_semantics = [#tpu.dimension_semantics<parallel>, #tpu.dimension_semantics<parallel>], iteration_bounds = array<i64: 1, 1>, scalar_prefetch = 0 : i64, scratch_operands = 0 : i64, tpu.core_type = #tpu.core_type<tc>, window_params = [{transform_indices = @transform_0, window_bounds = array<i64: 8, 24>}, {transform_indices = @transform_1, window_bounds = array<i64: 1, 256>}, {transform_indices = @transform_2, window_bounds = array<i64: 1, 256>}, {transform_indices = @transform_3, window_bounds = array<i64: 8, 256>}]} {
    %c0 = arith.constant 0 : index
    %c0_0 = arith.constant 0 : index
    %0 = vector.load %arg3[%c0, %c0_0] : memref<1x256xf32, #tpu.memory_space<vmem>>, vector<1x256xf32>
    %c0_1 = arith.constant 0 : index
    %c0_2 = arith.constant 0 : index
    %1 = vector.load %arg4[%c0_1, %c0_2] : memref<1x256xf32, #tpu.memory_space<vmem>>, vector<1x256xf32>
    %cst = arith.constant 0.000000e+00 : f32
    %2 = vector.broadcast %cst : f32 to vector<8x256xf32>
    %false = arith.constant false
    %3 = vector.broadcast %false : i1 to vector<8x256xi1>
    %c0_3 = arith.constant 0 : index
    %c0_4 = arith.constant 0 : index
    %4 = vector.load %arg2[%c0_3, %c0_4] : memref<8x24xf32, #tpu.memory_space<vmem>>, vector<8x1xf32>
    %c0_5 = arith.constant 0 : index
    %c6 = arith.constant 6 : index
    %5 = vector.load %arg2[%c0_5, %c6] : memref<8x24xf32, #tpu.memory_space<vmem>>, vector<8x1xf32>
    %c0_6 = arith.constant 0 : index
    %c12 = arith.constant 12 : index
    %6 = vector.load %arg2[%c0_6, %c12] : memref<8x24xf32, #tpu.memory_space<vmem>>, vector<8x1xf32>
    %c0_7 = arith.constant 0 : index
    %c18 = arith.constant 18 : index
    %7 = vector.load %arg2[%c0_7, %c18] : memref<8x24xf32, #tpu.memory_space<vmem>>, vector<8x1xf32>
    %8 = vector.broadcast %4 : vector<8x1xf32> to vector<8x256xf32>
    %9 = vector.broadcast %0 : vector<1x256xf32> to vector<8x256xf32>
    %10 = arith.subf %8, %9 : vector<8x256xf32>
    %11 = vector.broadcast %6 : vector<8x1xf32> to vector<8x256xf32>
    %12 = vector.broadcast %1 : vector<1x256xf32> to vector<8x256xf32>
    %13 = arith.subf %11, %12 : vector<8x256xf32>
    %14 = arith.mulf %10, %10 : vector<8x256xf32>
    %15 = arith.mulf %13, %13 : vector<8x256xf32>
    %16 = arith.addf %14, %15 : vector<8x256xf32>
    %17 = math.sqrt %16 : vector<8x256xf32>
    %18 = arith.addf %2, %17 : vector<8x256xf32>
    %19 = vector.broadcast %4 : vector<8x1xf32> to vector<8x256xf32>
    %20 = vector.broadcast %0 : vector<1x256xf32> to vector<8x256xf32>
    %21 = arith.cmpf ogt, %19, %20 : vector<8x256xf32>
    %22 = vector.broadcast %5 : vector<8x1xf32> to vector<8x256xf32>
    %23 = vector.broadcast %0 : vector<1x256xf32> to vector<8x256xf32>
    %24 = arith.cmpf ogt, %22, %23 : vector<8x256xf32>
    %25 = arith.xori %21, %24 : vector<8x256xi1>
    %26 = vector.broadcast %0 : vector<1x256xf32> to vector<8x256xf32>
    %27 = vector.broadcast %4 : vector<8x1xf32> to vector<8x256xf32>
    %28 = arith.subf %26, %27 : vector<8x256xf32>
    %29 = vector.broadcast %7 : vector<8x1xf32> to vector<8x256xf32>
    %30 = arith.mulf %29, %28 : vector<8x256xf32>
    %31 = vector.broadcast %6 : vector<8x1xf32> to vector<8x256xf32>
    %32 = arith.addf %30, %31 : vector<8x256xf32>
    %33 = vector.broadcast %1 : vector<1x256xf32> to vector<8x256xf32>
    %34 = arith.cmpf olt, %33, %32 : vector<8x256xf32>
    %35 = arith.andi %25, %34 : vector<8x256xi1>
    %36 = arith.xori %3, %35 : vector<8x256xi1>
    %c0_8 = arith.constant 0 : index
    %c1 = arith.constant 1 : index
    %37 = vector.load %arg2[%c0_8, %c1] : memref<8x24xf32, #tpu.memory_space<vmem>>, vector<8x1xf32>
    %c0_9 = arith.constant 0 : index
    %c7 = arith.constant 7 : index
    %38 = vector.load %arg2[%c0_9, %c7] : memref<8x24xf32, #tpu.memory_space<vmem>>, vector<8x1xf32>
    %c0_10 = arith.constant 0 : index
    %c13 = arith.constant 13 : index
    %39 = vector.load %arg2[%c0_10, %c13] : memref<8x24xf32, #tpu.memory_space<vmem>>, vector<8x1xf32>
    %c0_11 = arith.constant 0 : index
    %c19 = arith.constant 19 : index
    %40 = vector.load %arg2[%c0_11, %c19] : memref<8x24xf32, #tpu.memory_space<vmem>>, vector<8x1xf32>
    %41 = vector.broadcast %37 : vector<8x1xf32> to vector<8x256xf32>
    %42 = vector.broadcast %0 : vector<1x256xf32> to vector<8x256xf32>
    %43 = arith.subf %41, %42 : vector<8x256xf32>
    %44 = vector.broadcast %39 : vector<8x1xf32> to vector<8x256xf32>
    %45 = vector.broadcast %1 : vector<1x256xf32> to vector<8x256xf32>
    %46 = arith.subf %44, %45 : vector<8x256xf32>
    %47 = arith.mulf %43, %43 : vector<8x256xf32>
    %48 = arith.mulf %46, %46 : vector<8x256xf32>
    %49 = arith.addf %47, %48 : vector<8x256xf32>
    %50 = math.sqrt %49 : vector<8x256xf32>
    %51 = arith.addf %18, %50 : vector<8x256xf32>
    %52 = vector.broadcast %37 : vector<8x1xf32> to vector<8x256xf32>
    %53 = vector.broadcast %0 : vector<1x256xf32> to vector<8x256xf32>
    %54 = arith.cmpf ogt, %52, %53 : vector<8x256xf32>
    %55 = vector.broadcast %38 : vector<8x1xf32> to vector<8x256xf32>
    %56 = vector.broadcast %0 : vector<1x256xf32> to vector<8x256xf32>
    %57 = arith.cmpf ogt, %55, %56 : vector<8x256xf32>
    %58 = arith.xori %54, %57 : vector<8x256xi1>
    %59 = vector.broadcast %0 : vector<1x256xf32> to vector<8x256xf32>
    %60 = vector.broadcast %37 : vector<8x1xf32> to vector<8x256xf32>
    %61 = arith.subf %59, %60 : vector<8x256xf32>
    %62 = vector.broadcast %40 : vector<8x1xf32> to vector<8x256xf32>
    %63 = arith.mulf %62, %61 : vector<8x256xf32>
    %64 = vector.broadcast %39 : vector<8x1xf32> to vector<8x256xf32>
    %65 = arith.addf %63, %64 : vector<8x256xf32>
    %66 = vector.broadcast %1 : vector<1x256xf32> to vector<8x256xf32>
    %67 = arith.cmpf olt, %66, %65 : vector<8x256xf32>
    %68 = arith.andi %58, %67 : vector<8x256xi1>
    %69 = arith.xori %36, %68 : vector<8x256xi1>
    %c0_12 = arith.constant 0 : index
    %c2 = arith.constant 2 : index
    %70 = vector.load %arg2[%c0_12, %c2] : memref<8x24xf32, #tpu.memory_space<vmem>>, vector<8x1xf32>
    %c0_13 = arith.constant 0 : index
    %c8 = arith.constant 8 : index
    %71 = vector.load %arg2[%c0_13, %c8] : memref<8x24xf32, #tpu.memory_space<vmem>>, vector<8x1xf32>
    %c0_14 = arith.constant 0 : index
    %c14 = arith.constant 14 : index
    %72 = vector.load %arg2[%c0_14, %c14] : memref<8x24xf32, #tpu.memory_space<vmem>>, vector<8x1xf32>
    %c0_15 = arith.constant 0 : index
    %c20 = arith.constant 20 : index
    %73 = vector.load %arg2[%c0_15, %c20] : memref<8x24xf32, #tpu.memory_space<vmem>>, vector<8x1xf32>
    %74 = vector.broadcast %70 : vector<8x1xf32> to vector<8x256xf32>
    %75 = vector.broadcast %0 : vector<1x256xf32> to vector<8x256xf32>
    %76 = arith.subf %74, %75 : vector<8x256xf32>
    %77 = vector.broadcast %72 : vector<8x1xf32> to vector<8x256xf32>
    %78 = vector.broadcast %1 : vector<1x256xf32> to vector<8x256xf32>
    %79 = arith.subf %77, %78 : vector<8x256xf32>
    %80 = arith.mulf %76, %76 : vector<8x256xf32>
    %81 = arith.mulf %79, %79 : vector<8x256xf32>
    %82 = arith.addf %80, %81 : vector<8x256xf32>
    %83 = math.sqrt %82 : vector<8x256xf32>
    %84 = arith.addf %51, %83 : vector<8x256xf32>
    %85 = vector.broadcast %70 : vector<8x1xf32> to vector<8x256xf32>
    %86 = vector.broadcast %0 : vector<1x256xf32> to vector<8x256xf32>
    %87 = arith.cmpf ogt, %85, %86 : vector<8x256xf32>
    %88 = vector.broadcast %71 : vector<8x1xf32> to vector<8x256xf32>
    %89 = vector.broadcast %0 : vector<1x256xf32> to vector<8x256xf32>
    %90 = arith.cmpf ogt, %88, %89 : vector<8x256xf32>
    %91 = arith.xori %87, %90 : vector<8x256xi1>
    %92 = vector.broadcast %0 : vector<1x256xf32> to vector<8x256xf32>
    %93 = vector.broadcast %70 : vector<8x1xf32> to vector<8x256xf32>
    %94 = arith.subf %92, %93 : vector<8x256xf32>
    %95 = vector.broadcast %73 : vector<8x1xf32> to vector<8x256xf32>
    %96 = arith.mulf %95, %94 : vector<8x256xf32>
    %97 = vector.broadcast %72 : vector<8x1xf32> to vector<8x256xf32>
    %98 = arith.addf %96, %97 : vector<8x256xf32>
    %99 = vector.broadcast %1 : vector<1x256xf32> to vector<8x256xf32>
    %100 = arith.cmpf olt, %99, %98 : vector<8x256xf32>
    %101 = arith.andi %91, %100 : vector<8x256xi1>
    %102 = arith.xori %69, %101 : vector<8x256xi1>
    %c0_16 = arith.constant 0 : index
    %c3 = arith.constant 3 : index
    %103 = vector.load %arg2[%c0_16, %c3] : memref<8x24xf32, #tpu.memory_space<vmem>>, vector<8x1xf32>
    %c0_17 = arith.constant 0 : index
    %c9 = arith.constant 9 : index
    %104 = vector.load %arg2[%c0_17, %c9] : memref<8x24xf32, #tpu.memory_space<vmem>>, vector<8x1xf32>
    %c0_18 = arith.constant 0 : index
    %c15 = arith.constant 15 : index
    %105 = vector.load %arg2[%c0_18, %c15] : memref<8x24xf32, #tpu.memory_space<vmem>>, vector<8x1xf32>
    %c0_19 = arith.constant 0 : index
    %c21 = arith.constant 21 : index
    %106 = vector.load %arg2[%c0_19, %c21] : memref<8x24xf32, #tpu.memory_space<vmem>>, vector<8x1xf32>
    %107 = vector.broadcast %103 : vector<8x1xf32> to vector<8x256xf32>
    %108 = vector.broadcast %0 : vector<1x256xf32> to vector<8x256xf32>
    %109 = arith.subf %107, %108 : vector<8x256xf32>
    %110 = vector.broadcast %105 : vector<8x1xf32> to vector<8x256xf32>
    %111 = vector.broadcast %1 : vector<1x256xf32> to vector<8x256xf32>
    %112 = arith.subf %110, %111 : vector<8x256xf32>
    %113 = arith.mulf %109, %109 : vector<8x256xf32>
    %114 = arith.mulf %112, %112 : vector<8x256xf32>
    %115 = arith.addf %113, %114 : vector<8x256xf32>
    %116 = math.sqrt %115 : vector<8x256xf32>
    %117 = arith.addf %84, %116 : vector<8x256xf32>
    %118 = vector.broadcast %103 : vector<8x1xf32> to vector<8x256xf32>
    %119 = vector.broadcast %0 : vector<1x256xf32> to vector<8x256xf32>
    %120 = arith.cmpf ogt, %118, %119 : vector<8x256xf32>
    %121 = vector.broadcast %104 : vector<8x1xf32> to vector<8x256xf32>
    %122 = vector.broadcast %0 : vector<1x256xf32> to vector<8x256xf32>
    %123 = arith.cmpf ogt, %121, %122 : vector<8x256xf32>
    %124 = arith.xori %120, %123 : vector<8x256xi1>
    %125 = vector.broadcast %0 : vector<1x256xf32> to vector<8x256xf32>
    %126 = vector.broadcast %103 : vector<8x1xf32> to vector<8x256xf32>
    %127 = arith.subf %125, %126 : vector<8x256xf32>
    %128 = vector.broadcast %106 : vector<8x1xf32> to vector<8x256xf32>
    %129 = arith.mulf %128, %127 : vector<8x256xf32>
    %130 = vector.broadcast %105 : vector<8x1xf32> to vector<8x256xf32>
    %131 = arith.addf %129, %130 : vector<8x256xf32>
    %132 = vector.broadcast %1 : vector<1x256xf32> to vector<8x256xf32>
    %133 = arith.cmpf olt, %132, %131 : vector<8x256xf32>
    %134 = arith.andi %124, %133 : vector<8x256xi1>
    %135 = arith.xori %102, %134 : vector<8x256xi1>
    %c0_20 = arith.constant 0 : index
    %c4 = arith.constant 4 : index
    %136 = vector.load %arg2[%c0_20, %c4] : memref<8x24xf32, #tpu.memory_space<vmem>>, vector<8x1xf32>
    %c0_21 = arith.constant 0 : index
    %c10 = arith.constant 10 : index
    %137 = vector.load %arg2[%c0_21, %c10] : memref<8x24xf32, #tpu.memory_space<vmem>>, vector<8x1xf32>
    %c0_22 = arith.constant 0 : index
    %c16 = arith.constant 16 : index
    %138 = vector.load %arg2[%c0_22, %c16] : memref<8x24xf32, #tpu.memory_space<vmem>>, vector<8x1xf32>
    %c0_23 = arith.constant 0 : index
    %c22 = arith.constant 22 : index
    %139 = vector.load %arg2[%c0_23, %c22] : memref<8x24xf32, #tpu.memory_space<vmem>>, vector<8x1xf32>
    %140 = vector.broadcast %136 : vector<8x1xf32> to vector<8x256xf32>
    %141 = vector.broadcast %0 : vector<1x256xf32> to vector<8x256xf32>
    %142 = arith.subf %140, %141 : vector<8x256xf32>
    %143 = vector.broadcast %138 : vector<8x1xf32> to vector<8x256xf32>
    %144 = vector.broadcast %1 : vector<1x256xf32> to vector<8x256xf32>
    %145 = arith.subf %143, %144 : vector<8x256xf32>
    %146 = arith.mulf %142, %142 : vector<8x256xf32>
    %147 = arith.mulf %145, %145 : vector<8x256xf32>
    %148 = arith.addf %146, %147 : vector<8x256xf32>
    %149 = math.sqrt %148 : vector<8x256xf32>
    %150 = arith.addf %117, %149 : vector<8x256xf32>
    %151 = vector.broadcast %136 : vector<8x1xf32> to vector<8x256xf32>
    %152 = vector.broadcast %0 : vector<1x256xf32> to vector<8x256xf32>
    %153 = arith.cmpf ogt, %151, %152 : vector<8x256xf32>
    %154 = vector.broadcast %137 : vector<8x1xf32> to vector<8x256xf32>
    %155 = vector.broadcast %0 : vector<1x256xf32> to vector<8x256xf32>
    %156 = arith.cmpf ogt, %154, %155 : vector<8x256xf32>
    %157 = arith.xori %153, %156 : vector<8x256xi1>
    %158 = vector.broadcast %0 : vector<1x256xf32> to vector<8x256xf32>
    %159 = vector.broadcast %136 : vector<8x1xf32> to vector<8x256xf32>
    %160 = arith.subf %158, %159 : vector<8x256xf32>
    %161 = vector.broadcast %139 : vector<8x1xf32> to vector<8x256xf32>
    %162 = arith.mulf %161, %160 : vector<8x256xf32>
    %163 = vector.broadcast %138 : vector<8x1xf32> to vector<8x256xf32>
    %164 = arith.addf %162, %163 : vector<8x256xf32>
    %165 = vector.broadcast %1 : vector<1x256xf32> to vector<8x256xf32>
    %166 = arith.cmpf olt, %165, %164 : vector<8x256xf32>
    %167 = arith.andi %157, %166 : vector<8x256xi1>
    %168 = arith.xori %135, %167 : vector<8x256xi1>
    %c0_24 = arith.constant 0 : index
    %c5 = arith.constant 5 : index
    %169 = vector.load %arg2[%c0_24, %c5] : memref<8x24xf32, #tpu.memory_space<vmem>>, vector<8x1xf32>
    %c0_25 = arith.constant 0 : index
    %c11 = arith.constant 11 : index
    %170 = vector.load %arg2[%c0_25, %c11] : memref<8x24xf32, #tpu.memory_space<vmem>>, vector<8x1xf32>
    %c0_26 = arith.constant 0 : index
    %c17 = arith.constant 17 : index
    %171 = vector.load %arg2[%c0_26, %c17] : memref<8x24xf32, #tpu.memory_space<vmem>>, vector<8x1xf32>
    %c0_27 = arith.constant 0 : index
    %c23 = arith.constant 23 : index
    %172 = vector.load %arg2[%c0_27, %c23] : memref<8x24xf32, #tpu.memory_space<vmem>>, vector<8x1xf32>
    %173 = vector.broadcast %169 : vector<8x1xf32> to vector<8x256xf32>
    %174 = vector.broadcast %0 : vector<1x256xf32> to vector<8x256xf32>
    %175 = arith.subf %173, %174 : vector<8x256xf32>
    %176 = vector.broadcast %171 : vector<8x1xf32> to vector<8x256xf32>
    %177 = vector.broadcast %1 : vector<1x256xf32> to vector<8x256xf32>
    %178 = arith.subf %176, %177 : vector<8x256xf32>
    %179 = arith.mulf %175, %175 : vector<8x256xf32>
    %180 = arith.mulf %178, %178 : vector<8x256xf32>
    %181 = arith.addf %179, %180 : vector<8x256xf32>
    %182 = math.sqrt %181 : vector<8x256xf32>
    %183 = arith.addf %150, %182 : vector<8x256xf32>
    %184 = vector.broadcast %169 : vector<8x1xf32> to vector<8x256xf32>
    %185 = vector.broadcast %0 : vector<1x256xf32> to vector<8x256xf32>
    %186 = arith.cmpf ogt, %184, %185 : vector<8x256xf32>
    %187 = vector.broadcast %170 : vector<8x1xf32> to vector<8x256xf32>
    %188 = vector.broadcast %0 : vector<1x256xf32> to vector<8x256xf32>
    %189 = arith.cmpf ogt, %187, %188 : vector<8x256xf32>
    %190 = arith.xori %186, %189 : vector<8x256xi1>
    %191 = vector.broadcast %0 : vector<1x256xf32> to vector<8x256xf32>
    %192 = vector.broadcast %169 : vector<8x1xf32> to vector<8x256xf32>
    %193 = arith.subf %191, %192 : vector<8x256xf32>
    %194 = vector.broadcast %172 : vector<8x1xf32> to vector<8x256xf32>
    %195 = arith.mulf %194, %193 : vector<8x256xf32>
    %196 = vector.broadcast %171 : vector<8x1xf32> to vector<8x256xf32>
    %197 = arith.addf %195, %196 : vector<8x256xf32>
    %198 = vector.broadcast %1 : vector<1x256xf32> to vector<8x256xf32>
    %199 = arith.cmpf olt, %198, %197 : vector<8x256xf32>
    %200 = arith.andi %190, %199 : vector<8x256xi1>
    %201 = arith.xori %168, %200 : vector<8x256xi1>
    %cst_28 = arith.constant 1.000000e+00 : f32
    %cst_29 = arith.constant -1.000000e+00 : f32
    %202 = vector.broadcast %cst_28 : f32 to vector<8x256xf32>
    %203 = vector.broadcast %cst_29 : f32 to vector<8x256xf32>
    %204 = arith.select %201, %202, %203 : vector<8x256xi1>, vector<8x256xf32>
    %205 = arith.mulf %204, %183 : vector<8x256xf32>
    %cst_30 = arith.constant 3.125000e-02 : f32
    %206 = vector.broadcast %cst_30 : f32 to vector<8x256xf32>
    %207 = arith.mulf %205, %206 : vector<8x256xf32>
    %208 = arith.negf %207 : vector<8x256xf32>
    %209 = math.exp %208 : vector<8x256xf32>
    %cst_31 = arith.constant 1.000000e+00 : f32
    %210 = vector.broadcast %cst_31 : f32 to vector<8x256xf32>
    %211 = arith.addf %210, %209 : vector<8x256xf32>
    %212 = arith.divf %210, %211 : vector<8x256xf32>
    %c0_32 = arith.constant 0 : index
    %c0_33 = arith.constant 0 : index
    %213 = vector.load %arg5[%c0_32, %c0_33] : memref<8x256xf32, #tpu.memory_space<vmem>>, vector<8x256xf32>
    tpu.vector_store %arg5[%c0_32, %c0_33], %212 {strides = array<i32>} : memref<8x256xf32, #tpu.memory_space<vmem>>, vector<8x256xf32>,
    return
  }
  func.func @transform_0(%arg0: i32, %arg1: i32) -> (i32, i32) {
    %c0_i32 = arith.constant 0 : i32
    %c0_i32_0 = arith.constant 0 : i32
    return %arg0, %c0_i32 : i32, i32
  }
  func.func @transform_1(%arg0: i32, %arg1: i32) -> (i32, i32) {
    %c0_i32 = arith.constant 0 : i32
    %c0_i32_0 = arith.constant 0 : i32
    return %c0_i32, %arg1 : i32, i32
  }
  func.func @transform_2(%arg0: i32, %arg1: i32) -> (i32, i32) {
    %c0_i32 = arith.constant 0 : i32
    %c0_i32_0 = arith.constant 0 : i32
    return %c0_i32, %arg1 : i32, i32
  }
  func.func @transform_3(%arg0: i32, %arg1: i32) -> (i32, i32) {
    %c0_i32 = arith.constant 0 : i32
    return %arg0, %arg1 : i32, i32
  }
}

</mosaic_0001>

<bundles_post_ra>
// kernel: tpu_custom_call.1
= control target key start
LH: loop header
LB: loop body
LE: loop exit
PB: predicated region body
PF: predicated region fallthrough
CT: control target
= control target key end

     0   :  { %8 = vsyncpa [#allocation3], 0  ;;  %s1477_s0 = inlined_call_operand.hbm [shape: f32[8,24], index: 0, kind: input, shape index: {}]   ;;  %s1478_s1 = inlined_call_operand.hbm [shape: f32[1,256], index: 1, kind: input, shape index: {}]   ;;  %s1479_s2 = inlined_call_operand.hbm [shape: f32[1,256], index: 2, kind: input, shape index: {}]   ;;  %s1480_s3 = inlined_call_operand.hbm [shape: f32[8,256], index: 3, kind: output, shape index: {}]  }
   0x1   :  { %9 = vsyncpa [#allocation6], 0  ;;  %s27_s14 = sshll.u32 %s1478_s1, 4  ;;  %s28_s14 = int_to_ptr.hbm [resolvable:$true] %s27_s14 }
   0x2   :  { %10 = vsyncpa [#allocation4], 0  ;;  %s742_s15 = smov [#allocation5]   ;;  %s16_s19 = sshll.u32 %s1477_s0, 4  ;;  %s17_s19 = int_to_ptr.hbm [resolvable:$true] %s16_s19 }
   0x3   :  { %s29_s16 = sshll.u32 %s742_s15, 4  ;;  %s743_s20 = smov [#allocation2]   ;;  %s30_s16 = int_to_ptr.vmem [resolvable:$true] %s29_s16 }
   0x4   :  { %32 = dma.hbm_to_vmem [thread:$0]  %s28_s14, 32, %s30_s16, [#allocation6]  }
   0x5   :  { %s18_s21 = sshll.u32 %s743_s20, 4  ;;  %s38_s24 = sshll.u32 %s1479_s2, 4  ;;  %s19_s21 = int_to_ptr.vmem [resolvable:$true] %s18_s21  ;;  %s39_s24 = int_to_ptr.hbm [resolvable:$true] %s38_s24 }
   0x6   :  { %21 = dma.hbm_to_vmem [thread:$0]  %s17_s19, 128, %s19_s21, [#allocation3]  }
   0x7   :  { %s744_s1 = smov [#allocation7]  }
   0x8   :  { %s40_s25 = sshll.u32 %s744_s1, 4  ;;  %s41_s25 = int_to_ptr.vmem [resolvable:$true] %s40_s25 }
   0x9   :  { %43 = dma.hbm_to_vmem [thread:$0]  %s39_s24, 32, %s41_s25, [#allocation6]  }
   0xa   :  { %736 = dma.done.wait [#allocation3], 128  }
   0xb   :  { %737 = vsyncadd [#allocation3], 4294967168 }
   0xc   :  { %738 = dma.done.wait [#allocation6], 64  }
   0xd   :  { %739 = vsyncadd [#allocation6], 4294967232  ;;  %v745_v0 = vmov 1   ;;  %v746_v1 = vmov 6   ;;  %v747_v2 = vmov 0   ;;  %v800_v3 = vld [vmem:[#allocation2] sm:$0xff] }
   0xe   :  { %587 = vset.pattern.permute.xlu2 %v745_v0  ;;  %585 = vset.pattern.permute.xlu1 %v746_v1  ;;  %v748_v4 = vmov 13   ;;  %v749_v5 = vmov 18   ;;  %v750_v6 = vmov 12   ;;  %v751_v7 = vmov 2   ;;  %v56_v26 = vld [vmem:[#allocation5] sm:$0x3] }
   0xf   :  { %583 = vset.pattern.permute.xlu0 %v747_v2  ;;  %139 = vperm.xlu2 %587, %v800_v3   ;;  %v752_v8 = vmov 7   ;;  %v753_v9 = vmov 14   ;;  %v754_v10 = vmov 15   ;;  %v755_v11 = vmov 3   ;;  %v57_v27 = vld [vmem:[#allocation7] sm:$0x3] }
  0x10   :  { %117 = vperm.xlu1 %585, %v800_v3   ;;  %61 = vperm.xlu0 %583, %v800_v3   ;;  %v756_v12 = vmov 5   ;;  %v757_v13 = vmov 16   ;;  %v758_v14 = vmov 4   ;;  %v759_v15 = vmov 22   ;;  %s770_s0 = smov [#allocation8]   ;;  %s541_s28 = sshll.u32 %s1480_s3, 4  ;;  %s542_s28 = int_to_ptr.hbm [resolvable:$true] %s541_s28 }
  0x11   :  { %v760_v16 = vmov 19   ;;  %v761_v17 = vmov 17   ;;  %v762_v18 = vmov 11   ;;  %v763_v19 = vmov 21   ;;  %s539_s2 = sshll.u32 %s770_s0, 4  ;;  %s540_s2 = int_to_ptr.vmem [resolvable:$true] %s539_s2 }
  0x12   :  { %v764_v20 = vmov 20   ;;  %v765_v21 = vmov 23   ;;  %v766_v22 = vmov 8   ;;  %v767_v23 = vmov 10  }
  0x13   :  { %v768_v24 = vmov 9   ;;  %v828_v28 = vperm.slane %v56_v26, 0  ;;  %v830_v29 = vperm.slane %v57_v27, 0  ;;  %v832_v30 = vperm.slane %v56_v26, 1 }
  0x14   :  { %v834_v31 = vperm.slane %v57_v27, 1 }
  0x17   :  { %588 = vset.pattern.permute.xlu2 %v748_v4 }
  0x18   :  { %586 = vset.pattern.permute.xlu1 %v749_v5  ;;  %584 = vset.pattern.permute.xlu0 %v750_v6 }
  0x19   :  { %145 = vperm.xlu2 %588, %v800_v3   ;;  %127 = vperm.xlu1 %586, %v800_v3  }
  0x1a   :  { %72 = vperm.xlu0 %584, %v800_v3  }
  0x21   :  { %590 = vset.pattern.permute.xlu2 %v751_v7  ;;  %589 = vset.pattern.permute.xlu1 %v752_v8 }
  0x22   :  { %591 = vset.pattern.permute.xlu0 %v753_v9  ;;  %209 = vperm.xlu2 %590, %v800_v3  }
  0x23   :  { %185 = vperm.xlu1 %589, %v800_v3   ;;  %215 = vperm.xlu0 %591, %v800_v3  }
  0x2a   :  { %593 = vset.pattern.permute.xlu2 %v754_v10 }
  0x2b   :  { %592 = vset.pattern.permute.xlu1 %v755_v11  ;;  %285 = vperm.xlu2 %593, %v800_v3  }
  0x2c   :  { %279 = vperm.xlu1 %592, %v800_v3   ;;  %596 = vset.pattern.permute.xlu0 %v756_v12 }
  0x2d   :  { %419 = vperm.xlu0 %596, %v800_v3  }
  0x33   :  { %595 = vset.pattern.permute.xlu2 %v757_v13 }
  0x34   :  { %594 = vset.pattern.permute.xlu1 %v758_v14  ;;  %355 = vperm.xlu2 %595, %v800_v3  }
  0x35   :  { %349 = vperm.xlu1 %594, %v800_v3   ;;  %601 = vset.pattern.permute.xlu0 %v759_v15 }
  0x36   :  { %405 = vperm.xlu0 %601, %v800_v3  }
  0x3c   :  { %598 = vset.pattern.permute.xlu2 %v760_v16 }
  0x3d   :  { %597 = vset.pattern.permute.xlu1 %v761_v17  ;;  %195 = vperm.xlu2 %598, %v800_v3  }
  0x3e   :  { %425 = vperm.xlu1 %597, %v800_v3   ;;  %606 = vset.pattern.permute.xlu0 %v762_v18 }
  0x3f   :  { %465 = vperm.xlu0 %606, %v800_v3  }
  0x45   :  { %600 = vset.pattern.permute.xlu2 %v763_v19 }
  0x46   :  { %599 = vset.pattern.permute.xlu1 %v764_v20  ;;  %335 = vperm.xlu2 %600, %v800_v3  }
  0x47   :  { %265 = vperm.xlu1 %599, %v800_v3   ;;  %607 = vset.pattern.permute.xlu0 %v765_v21 }
  0x4e   :  { %603 = vset.pattern.permute.xlu2 %v765_v21 }
  0x4f   :  { %602 = vset.pattern.permute.xlu1 %v766_v22  ;;  %475 = vperm.xlu2 %603, %v800_v3  }
  0x50   :  { %255 = vperm.xlu1 %602, %v800_v3  }
  0x57   :  { %605 = vset.pattern.permute.xlu2 %v767_v23 }
  0x58   :  { %604 = vset.pattern.permute.xlu1 %v768_v24  ;;  %395 = vperm.xlu2 %605, %v800_v3  }
  0x59   :  { %325 = vperm.xlu1 %604, %v800_v3  }
  0x69   :  { %v826_v25 = vpop.permute.xlu2 %139 }
  0x6a   :  { %v142_v33 = vsub.f32 %v826_v25, %v828_v28  ;;  %v143_v35 = vsub.f32 %v826_v25, %v832_v30  ;;  %vm182_vm15 = vcmp.gt.f32.partialorder %v826_v25, %v828_v28 }
  0x6c   :  { %v150_v37 = vmul.f32 %v142_v33, %v142_v33  ;;  %v151_v39 = vmul.f32 %v143_v35, %v143_v35 }
  0x73   :  { %v836_v32 = vpop.permute.xlu2 %145 }
  0x74   :  { %v148_v34 = vsub.f32 %v836_v32, %v830_v29  ;;  %v149_v36 = vsub.f32 %v836_v32, %v834_v31 }
  0x76   :  { %v152_v38 = vmul.f32 %v148_v34, %v148_v34  ;;  %v153_v40 = vmul.f32 %v149_v36, %v149_v36 }
  0x78   :  { %v848_v42 = vadd.f32 %v152_v38, %v150_v37  ;;  %v852_v44 = vadd.f32 %v153_v40, %v151_v39 }
  0x7a   :  { %608 = vrsqrt.f32 %v848_v42  ;;  %vm163_vm0 = vcmp.eq.f32.partialorder %v848_v42, inf  ;;  %vm165_vm1 = vcmp.eq.f32.partialorder %v848_v42, 0.0  ;;  %vm175_vm2 = vcmp.eq.f32.partialorder %v852_v44, inf }
  0x7b   :  { %610 = vrsqrt.f32 %v852_v44  ;;  %vm177_vm3 = vcmp.eq.f32.partialorder %v852_v44, 0.0 }
  0x7c   :  { %v854_v45 = vpop.permute.xlu2 %209 }
  0x7d   :  { %v212_v63 = vsub.f32 %v854_v45, %v828_v28  ;;  %v213_v2 = vsub.f32 %v854_v45, %v832_v30 }
  0x7f   :  { %v220_v8 = vmul.f32 %v212_v63, %v212_v63  ;;  %v221_v10 = vmul.f32 %v213_v2, %v213_v2 }
  0x80   :  { %v609_v50 = vpop.eup %608 }
  0x81   :  { %v611_v54 = vpop.eup %610  ;;  %v157_v59 = vmul.f32 %v609_v50, %v848_v42 }
  0x82   :  { %v846_v41 = vpop.permute.xlu1 %117  ;;  %v850_v43 = vpop.permute.xlu0 %61  ;;  %v169_v61 = vmul.f32 %v611_v54, %v852_v44 }
  0x83   :  { %v69_v46 = vsub.f32 %v850_v43, %v828_v28  ;;  %v70_v47 = vsub.f32 %v850_v43, %v832_v30  ;;  %v158_v0 = vmul.f32 %v609_v50, %v157_v59  ;;  %v124_v39 = vsub.f32 %v828_v28, %v850_v43 }
  0x84   :  { %v170_v3 = vmul.f32 %v611_v54, %v169_v61  ;;  %vm120_vm6 = vcmp.gt.f32.partialorder %v846_v41, %v828_v28  ;;  %vm114_vm7 = vcmp.gt.f32.partialorder %v850_v43, %v828_v28  ;;  %vm121_vm8 = vcmp.gt.f32.partialorder %v846_v41, %v832_v30 }
  0x85   :  { %v82_v53 = vmul.f32 %v69_v46, %v69_v46  ;;  %v870_v55 = vpop.permute.xlu2 %285  ;;  %v83_v56 = vmul.f32 %v70_v47, %v70_v47  ;;  %v159_v9 = vmul.f32 0.5, %v158_v0  ;;  %v125_v47 = vsub.f32 %v832_v30, %v850_v43 }
  0x86   :  { %v171_v13 = vmul.f32 0.5, %v170_v3  ;;  %v288_v15 = vsub.f32 %v870_v55, %v830_v29  ;;  %v289_v17 = vsub.f32 %v870_v55, %v834_v31  ;;  %v178_v0 = vand.u32 2147483648, %v852_v44 }
  0x87   :  { %v160_v19 = vsub.f32 1.5, %v159_v9  ;;  %vm115_vm10 = vcmp.gt.f32.partialorder %v850_v43, %v832_v30 }
  0x88   :  { %v172_v21 = vsub.f32 1.5, %v171_v13  ;;  %v292_v24 = vmul.f32 %v288_v15, %v288_v15  ;;  %v293_v34 = vmul.f32 %v289_v17, %v289_v17 }
  0x89   :  { %v161_v35 = vmul.f32 %v609_v50, %v160_v19 }
  0x8a   :  { %v173_v38 = vmul.f32 %v611_v54, %v172_v21 }
  0x8b   :  { %v862_v48 = vpop.permute.xlu1 %127  ;;  %v162_v54 = vmul.f32 %v161_v35, %v848_v42 }
  0x8c   :  { %v864_v49 = vpop.permute.xlu0 %72  ;;  %v130_v61 = vmul.f32 %v862_v48, %v124_v39  ;;  %v131_v3 = vmul.f32 %v862_v48, %v125_v47 }
  0x8d   :  { %v80_v51 = vsub.f32 %v864_v49, %v830_v29  ;;  %v81_v52 = vsub.f32 %v864_v49, %v834_v31  ;;  %v164_v48 = vsel %vm163_vm0, %v848_v42, %v162_v54 }
  0x8e   :  { %v892_v7 = vpop.permute.xlu2 %355  ;;  %v969_v19 = vadd.f32 %v130_v61, %v864_v49 }
  0x8f   :  { %v84_v57 = vmul.f32 %v80_v51, %v80_v51  ;;  %v85_v58 = vmul.f32 %v81_v52, %v81_v52  ;;  %v192_v51 = vsub.f32 %v828_v28, %v826_v25  ;;  %v359_v9 = vsub.f32 %v892_v7, %v834_v31 }
  0x90   :  { %vm134_vm12 = vcmp.lt.f32.partialorder %v830_v29, %v969_v19 }
  0x91   :  { %v873_v60 = vadd.f32 %v84_v57, %v82_v53  ;;  %v876_v62 = vadd.f32 %v85_v58, %v83_v56  ;;  %v193_v53 = vsub.f32 %v832_v30, %v826_v25  ;;  %v166_v57 = vand.u32 2147483648, %v848_v42 }
  0x92   :  { %v174_v58 = vmul.f32 %v173_v38, %v852_v44  ;;  %v982_v35 = vmul.f32 %v359_v9, %v359_v9 }
  0x93   :  { %612 = vrsqrt.f32 %v873_v60  ;;  %vm95_vm4 = vcmp.eq.f32.partialorder %v873_v60, inf  ;;  %vm107_vm5 = vcmp.eq.f32.partialorder %v876_v62, inf  ;;  %vm97_vm9 = vcmp.eq.f32.partialorder %v873_v60, 0.0 }
  0x94   :  { %614 = vrsqrt.f32 %v876_v62  ;;  %v176_v15 = vsel %vm175_vm2, %v852_v44, %v174_v58  ;;  %vm109_vm11 = vcmp.eq.f32.partialorder %v876_v62, 0.0 }
  0x95   :  { %v881_v1 = vpop.permute.xlu1 %185  ;;  %v886_v4 = vpop.permute.xlu0 %215  ;;  %v989_v39 = vsel %vm177_vm3, %v178_v0, %v176_v15 }
  0x96   :  { %v218_v5 = vsub.f32 %v886_v4, %v830_v29  ;;  %v219_v6 = vsub.f32 %v886_v4, %v834_v31  ;;  %vm188_vm13 = vcmp.gt.f32.partialorder %v881_v1, %v828_v28  ;;  %vm189_vm14 = vcmp.gt.f32.partialorder %v881_v1, %v832_v30 }
  0x97   :  { %v196_v40 = vpop.permute.xlu2 %195  ;;  %v1489_v1 = vsub.f32 %v828_v28, %v854_v45 }
  0x98   :  { %v222_v11 = vmul.f32 %v218_v5, %v218_v5  ;;  %v223_v12 = vmul.f32 %v219_v6, %v219_v6  ;;  %v358_v5 = vsub.f32 %v892_v7, %v830_v29  ;;  %v198_v13 = vmul.f32 %v196_v40, %v192_v51 }
  0x99   :  { %v894_v14 = vpop.eup %612  ;;  %v199_v21 = vmul.f32 %v196_v40, %v193_v53 }
  0x9a   :  { %v898_v16 = vpop.eup %614  ;;  %v902_v18 = vadd.f32 %v222_v11, %v220_v8  ;;  %v904_v20 = vadd.f32 %v223_v12, %v221_v10  ;;  %v89_v23 = vmul.f32 %v894_v14, %v873_v60  ;;  %v994_v40 = vadd.f32 %v198_v13, %v836_v32 }
  0x9b   :  { %v101_v33 = vmul.f32 %v898_v16, %v876_v62  ;;  %v1002_v51 = vadd.f32 %v199_v21, %v836_v32 }
  0x9c   :  { %616 = vrsqrt.f32 %v902_v18  ;;  %v90_v46 = vmul.f32 %v894_v14, %v89_v23  ;;  %vm202_vm0 = vcmp.lt.f32.partialorder %v830_v29, %v994_v40  ;;  %vm233_vm3 = vcmp.eq.f32.partialorder %v902_v18, inf }
  0x9d   :  { %618 = vrsqrt.f32 %v904_v20  ;;  %v102_v50 = vmul.f32 %v898_v16, %v101_v33 }
  0x9e   :  { %v906_v22 = vpop.permute.xlu1 %279  ;;  %v91_v63 = vmul.f32 0.5, %v90_v46 }
  0x9f   :  { %v282_v26 = vsub.f32 %v906_v22, %v828_v28  ;;  %v283_v27 = vsub.f32 %v906_v22, %v832_v30  ;;  %v103_v8 = vmul.f32 0.5, %v102_v50  ;;  %v953_v10 = vpop.permute.xlu0 %419  ;;  %v332_v44 = vsub.f32 %v828_v28, %v906_v22 }
  0xa0   :  { %v92_v23 = vsub.f32 1.5, %v91_v63  ;;  %v423_v42 = vsub.f32 %v953_v10, %v832_v30  ;;  %v472_v61 = vsub.f32 %v828_v28, %v953_v10  ;;  %v473_v63 = vsub.f32 %v832_v30, %v953_v10 }
  0xa1   :  { %v290_v36 = vmul.f32 %v282_v26, %v282_v26  ;;  %v291_v37 = vmul.f32 %v283_v27, %v283_v27  ;;  %v974_v26 = vadd.f32 %v131_v3, %v864_v49  ;;  %v976_v27 = vmul.f32 %v358_v5, %v358_v5 }
  0xa2   :  { %v938_v59 = vpop.eup %616  ;;  %v104_v33 = vsub.f32 1.5, %v103_v8  ;;  %v93_v50 = vmul.f32 %v894_v14, %v92_v23  ;;  %v431_v9 = vmul.f32 %v423_v42, %v423_v42  ;;  %vm462_vm2 = vcmp.gt.f32.partialorder %v953_v10, %v828_v28 }
  0xa3   :  { %v925_v52 = vadd.f32 %v292_v24, %v290_v36  ;;  %v933_v56 = vadd.f32 %v293_v34, %v291_v37  ;;  %v943_v2 = vpop.eup %618  ;;  %v227_v17 = vmul.f32 %v938_v59, %v902_v18  ;;  %v980_v34 = vsel %vm165_vm1, %v166_v57, %v164_v48  ;;  %v336_v36 = vpop.permute.xlu2 %335 }
  0xa4   :  { %v239_v24 = vmul.f32 %v943_v2, %v904_v20  ;;  %v422_v37 = vsub.f32 %v953_v10, %v828_v28  ;;  %v333_v57 = vsub.f32 %v832_v30, %v906_v22  ;;  %v105_v58 = vmul.f32 %v898_v16, %v104_v33 }
  0xa5   :  { %620 = vrsqrt.f32 %v925_v52  ;;  %v228_v47 = vmul.f32 %v938_v59, %v227_v17  ;;  %v94_v17 = vmul.f32 %v93_v50, %v873_v60  ;;  %vm183_vm1 = vcmp.gt.f32.partialorder %v826_v25, %v832_v30 }
  0xa6   :  { %622 = vrsqrt.f32 %v933_v56  ;;  %v240_v53 = vmul.f32 %v943_v2, %v239_v24  ;;  %v430_v3 = vmul.f32 %v422_v37, %v422_v37  ;;  %v106_v42 = vmul.f32 %v105_v58, %v876_v62 }
  0xa7   :  { %v949_v6 = vpop.permute.xlu1 %349  ;;  %v229_v48 = vmul.f32 0.5, %v228_v47  ;;  %v338_v47 = vmul.f32 %v336_v36, %v332_v44  ;;  %v339_v58 = vmul.f32 %v336_v36, %v333_v57  ;;  %v96_v11 = vsel %vm95_vm4, %v873_v60, %v94_v17  ;;  %vm122_vm4 = vmxor %vm114_vm7, %vm120_vm6 }
  0xa8   :  { %v352_v32 = vsub.f32 %v949_v6, %v828_v28  ;;  %v353_v13 = vsub.f32 %v949_v6, %v832_v30  ;;  %v406_v15 = vpop.permute.xlu0 %405  ;;  %v241_v21 = vmul.f32 0.5, %v240_v53  ;;  %v402_v50 = vsub.f32 %v828_v28, %v949_v6 }
  0xa9   :  { %v403_v53 = vsub.f32 %v832_v30, %v949_v6  ;;  %v230_v44 = vsub.f32 1.5, %v229_v48  ;;  %v108_v36 = vsel %vm107_vm5, %v876_v62, %v106_v42  ;;  %v1481_v17 = vand.u32 2147483648, %v873_v60 }
  0xaa   :  { %v360_v24 = vmul.f32 %v352_v32, %v352_v32  ;;  %v361_v12 = vmul.f32 %v353_v13, %v353_v13  ;;  %v408_v57 = vmul.f32 %v406_v15, %v402_v50  ;;  %vm245_vm5 = vcmp.eq.f32.partialorder %v904_v20, inf }
  0xab   :  { %v991_v49 = vpop.eup %620  ;;  %v476_v14 = vpop.permute.xlu2 %475  ;;  %vm392_vm6 = vcmp.gt.f32.partialorder %v949_v6, %v828_v28 }
  0xac   :  { %v1009_v54 = vpop.eup %622  ;;  %v297_v16 = vmul.f32 %v991_v49, %v925_v52  ;;  %v1075_v38 = vadd.f32 %v976_v27, %v360_v24  ;;  %v479_v48 = vmul.f32 %v476_v14, %v473_v63  ;;  %v1482_v24 = vand.u32 2147483648, %v876_v62 }
  0xad   :  { %v309_v23 = vmul.f32 %v1009_v54, %v933_v56 }
  0xae   :  { %v298_v32 = vmul.f32 %v991_v49, %v297_v16  ;;  %v242_v16 = vsub.f32 1.5, %v241_v21  ;;  %v99_v21 = vsel %vm97_vm9, %v1481_v17, %v96_v11  ;;  %v1108_v11 = vadd.f32 %v338_v47, %v870_v55  ;;  %vm1119_vm9 = vmxor %vm115_vm10, %vm121_vm8 }
  0xaf   :  { %v310_v46 = vmul.f32 %v1009_v54, %v309_v23  ;;  %v231_v23 = vmul.f32 %v938_v59, %v230_v44  ;;  %vm1138_vm8 = vmand %vm122_vm4, %vm134_vm12  ;;  %v1160_v19 = vadd.f32 %v980_v34, %v99_v21  ;;  %vm1493_vm12 = vcmp.lt.f32.partialorder %v834_v31, %v1002_v51 }
  0xb0   :  { %v1027_v0 = vpop.permute.xlu1 %425  ;;  %v299_v27 = vmul.f32 0.5, %v298_v32  ;;  %v243_v60 = vmul.f32 %v943_v2, %v242_v16  ;;  %v1126_v2 = vadd.f32 %v408_v57, %v892_v7  ;;  %vm1150_vm10 = vmxor %vm182_vm15, %vm188_vm13  ;;  %v1492_v32 = vsub.f32 %v832_v30, %v854_v45 }
  0xb1   :  { %v428_v5 = vsub.f32 %v1027_v0, %v830_v29  ;;  %v429_v8 = vsub.f32 %v1027_v0, %v834_v31  ;;  %v311_v59 = vmul.f32 0.5, %v310_v46  ;;  %v466_v46 = vpop.permute.xlu0 %465  ;;  %vm191_vm15 = vmxor %vm183_vm1, %vm189_vm14  ;;  %v1177_v34 = vadd.f32 %v479_v48, %v1027_v0 }
  0xb2   :  { %v300_v43 = vsub.f32 1.5, %v299_v27  ;;  %v244_v47 = vmul.f32 %v243_v60, %v904_v20  ;;  %vm468_vm13 = vcmp.gt.f32.partialorder %v466_v46, %v828_v28  ;;  %vm1192_vm14 = vmand %vm1150_vm10, %vm202_vm0  ;;  %vm469_vm4 = vcmp.gt.f32.partialorder %v466_v46, %v832_v30 }
  0xb3   :  { %v432_v33 = vmul.f32 %v428_v5, %v428_v5  ;;  %v433_v37 = vmul.f32 %v429_v8, %v429_v8  ;;  %v312_v50 = vsub.f32 1.5, %v311_v59  ;;  %vm412_vm7 = vcmp.lt.f32.partialorder %v830_v29, %v1126_v2  ;;  %vm1237_vm0 = vmxor %vm462_vm2, %vm468_vm13 }
  0xb4   :  { %v301_v44 = vmul.f32 %v991_v49, %v300_v43  ;;  %v246_v27 = vsel %vm245_vm5, %v904_v20, %v244_v47  ;;  %v318_v46 = vand.u32 2147483648, %v933_v56  ;;  %v376_v40 = vand.u32 2147483648, %v1075_v38 }
  0xb5   :  { %v1064_v5 = vadd.f32 %v432_v33, %v430_v3  ;;  %v1066_v8 = vadd.f32 %v433_v37, %v431_v9  ;;  %v409_v3 = vmul.f32 %v406_v15, %v403_v53  ;;  %v478_v9 = vmul.f32 %v476_v14, %v472_v61 }
  0xb6   :  { %v1094_v15 = vadd.f32 %v982_v35, %v361_v12  ;;  %v111_v33 = vsel %vm109_vm11, %v1482_v24, %v108_v36  ;;  %v1111_v12 = vadd.f32 %v339_v58, %v870_v55  ;;  %v248_v35 = vand.u32 2147483648, %v904_v20  ;;  %vm1205_vm11 = vmand %vm191_vm15, %vm1493_vm12 }
  0xb7   :  { %624 = vrsqrt.f32 %v1064_v5  ;;  %v1129_v55 = vadd.f32 %v409_v3, %v892_v7  ;;  %v1155_v61 = vadd.f32 %v478_v9, %v1027_v0  ;;  %v1163_v63 = vadd.f32 %v989_v39, %v111_v33  ;;  %v396_v39 = vpop.permute.xlu2 %395 }
  0xb8   :  { %626 = vrsqrt.f32 %v1066_v8  ;;  %v232_v37 = vmul.f32 %v231_v23, %v902_v18  ;;  %v306_v0 = vand.u32 2147483648, %v925_v52  ;;  %vm398_vm10 = vcmp.gt.f32.partialorder %v396_v39, %v828_v28 }
  0xb9   :  { %v266_v13 = vpop.permute.xlu1 %265  ;;  %628 = vrsqrt.f32 %v1075_v38  ;;  %vm399_vm1 = vcmp.gt.f32.partialorder %v396_v39, %v832_v30  ;;  %vm1496_vm12 = vcmp.lt.f32.partialorder %v834_v31, %v974_v26  ;;  %v313_v9 = vmul.f32 %v1009_v54, %v312_v50 }
  0xba   :  { %630 = vrsqrt.f32 %v1094_v15  ;;  %v268_v53 = vmul.f32 %v266_v13, %v1489_v1  ;;  %v269_v58 = vmul.f32 %v266_v13, %v1492_v32  ;;  %vm1223_vm15 = vmand %vm1119_vm9, %vm1496_vm12  ;;  %v234_v51 = vsel %vm233_vm3, %v902_v18, %v232_v37 }
  0xbb   :  { %vm1501_vm9 = vcmp.gt.f32.partialorder %v953_v10, %v832_v30  ;;  %v302_v33 = vmul.f32 %v301_v44, %v925_v52  ;;  %v1512_v37 = vand.u32 2147483648, %v902_v18 }
  0xbc   :  { %vm1262_vm3 = vmxor %vm1501_vm9, %vm469_vm4  ;;  %v270_v21 = vadd.f32 %v268_v53, %v886_v4  ;;  %v271_v24 = vadd.f32 %v269_v58, %v886_v4  ;;  %vm1506_vm9 = vcmp.gt.f32.partialorder %v854_v45, %v828_v28 }
  0xbd   :  { %v1142_v14 = vpop.eup %624  ;;  %vm1279_vm4 = vmxor %vm392_vm6, %vm398_vm10  ;;  %vm1509_vm10 = vcmp.gt.f32.partialorder %v854_v45, %v832_v30 }
  0xbe   :  { %v1168_v42 = vpop.eup %626  ;;  %v437_v16 = vmul.f32 %v1142_v14, %v1064_v5 }
  0xbf   :  { %v629_v36 = vpop.eup %628  ;;  %v449_v57 = vmul.f32 %v1168_v42, %v1066_v8 }
  0xc0   :  { %v367_v48 = vmul.f32 %v629_v36, %v1075_v38  ;;  %v438_v13 = vmul.f32 %v1142_v14, %v437_v16  ;;  %v631_v23 = vpop.eup %630 }
  0xc1   :  { %v450_v54 = vmul.f32 %v1168_v42, %v449_v57  ;;  %v379_v43 = vmul.f32 %v631_v23, %v1094_v15 }
  0xc2   :  { %v256_v3 = vpop.permute.xlu1 %255  ;;  %v368_v60 = vmul.f32 %v629_v36, %v367_v48  ;;  %v439_v59 = vmul.f32 0.5, %v438_v13 }
  0xc3   :  { %vm258_vm5 = vcmp.gt.f32.partialorder %v256_v3, %v828_v28  ;;  %vm259_vm2 = vcmp.gt.f32.partialorder %v256_v3, %v832_v30  ;;  %v451_v7 = vmul.f32 0.5, %v450_v54  ;;  %v380_v32 = vmul.f32 %v631_v23, %v379_v43 }
  0xc4   :  { %vm1288_vm13 = vmxor %vm1506_vm9, %vm258_vm5  ;;  %vm1513_vm5 = vcmp.eq.f32.partialorder %v902_v18, 0.0  ;;  %vm1514_vm9 = vcmp.eq.f32.partialorder %v904_v20, 0.0  ;;  %v369_v1 = vmul.f32 0.5, %v368_v60  ;;  %v440_v53 = vsub.f32 1.5, %v439_v59 }
  0xc5   :  { %vm1299_vm12 = vmxor %vm1509_vm10, %vm259_vm2  ;;  %v237_v47 = vsel %vm1513_vm5, %v1512_v37, %v234_v51  ;;  %v249_v50 = vsel %vm1514_vm9, %v248_v35, %v246_v27  ;;  %vm1515_vm2 = vcmp.gt.f32.partialorder %v949_v6, %v832_v30  ;;  %vm272_vm5 = vcmp.lt.f32.partialorder %v830_v29, %v270_v21 }
  0xc6   :  { %vm1317_vm10 = vmxor %vm1515_vm2, %vm399_vm1  ;;  %v314_v18 = vmul.f32 %v313_v9, %v933_v56  ;;  %v452_v20 = vsub.f32 1.5, %v451_v7  ;;  %vm273_vm9 = vcmp.lt.f32.partialorder %v834_v31, %v271_v24  ;;  %vm1520_vm1 = vcmp.eq.f32.partialorder %v925_v52, inf }
  0xc7   :  { %vm1326_vm6 = vmand %vm1288_vm13, %vm272_vm5  ;;  %v304_v6 = vsel %vm1520_vm1, %v925_v52, %v302_v33  ;;  %v370_v39 = vsub.f32 1.5, %v369_v1  ;;  %v441_v58 = vmul.f32 %v1142_v14, %v440_v53  ;;  %v250_v16 = vadd.f32 %v237_v47, %v1160_v19 }
  0xc8   :  { %vm1336_vm2 = vmand %vm1299_vm12, %vm273_vm9  ;;  %v381_v51 = vmul.f32 0.5, %v380_v32  ;;  %v453_v57 = vmul.f32 %v1168_v42, %v452_v20  ;;  %v251_v3 = vadd.f32 %v249_v50, %v1163_v63  ;;  %vm1525_vm1 = vcmp.lt.f32.partialorder %v834_v31, %v1129_v55 }
  0xc9   :  { %vm1349_vm5 = vmand %vm1279_vm4, %vm412_vm7  ;;  %v371_v19 = vmul.f32 %v629_v36, %v370_v39  ;;  %vm1531_vm9 = vcmp.eq.f32.partialorder %v925_v52, 0.0  ;;  %v442_v9 = vmul.f32 %v441_v58, %v1064_v5  ;;  %v769_v33 = vmov -1.0  }
  0xca   :  { %vm1363_vm13 = vmand %vm1317_vm10, %vm1525_vm1  ;;  %v307_v55 = vsel %vm1531_vm9, %v306_v0, %v304_v6  ;;  %vm1532_vm10 = vcmp.eq.f32.partialorder %v933_v56, inf  ;;  %v382_v27 = vsub.f32 1.5, %v381_v51  ;;  %vm1533_vm1 = vcmp.lt.f32.partialorder %v830_v29, %v1155_v61 }
  0xcb   :  { %v326_v42 = vpop.permute.xlu1 %325  ;;  %vm1528_vm7 = vmxor %vm1138_vm8, %vm1192_vm14  ;;  %v316_v36 = vsel %vm1532_vm10, %v933_v56, %v314_v18  ;;  %v372_v61 = vmul.f32 %v371_v19, %v1075_v38  ;;  %v454_v25 = vmul.f32 %v453_v57, %v1066_v8  ;;  %v1540_v0 = vmov 0 }
  0xcc   :  { %vm1374_vm4 = vmxor %vm1528_vm7, %vm1326_vm6  ;;  %vm328_vm9 = vcmp.gt.f32.partialorder %v326_v42, %v828_v28  ;;  %vm329_vm7 = vcmp.gt.f32.partialorder %v326_v42, %v832_v30  ;;  %v383_v49 = vmul.f32 %v631_v23, %v382_v27  ;;  %v320_v26 = vadd.f32 %v307_v55, %v250_v16 }
  0xcd   :  { %vm1391_vm8 = vmand %vm1237_vm0, %vm1533_vm1  ;;  %vm1539_vm0 = vcmp.lt.f32.partialorder %v834_v31, %v1177_v34  ;;  %vm375_vm1 = vcmp.eq.f32.partialorder %v1075_v38, 0.0 }
  0xce   :  { %vm1536_vm14 = vmxor %vm1223_vm15, %vm1205_vm11  ;;  %vm1542_vm11 = vcmp.gt.f32.partialorder %v906_v22, %v828_v28  ;;  %v384_v13 = vmul.f32 %v383_v49, %v1094_v15 }
  0xcf   :  { %vm1402_vm6 = vmxor %vm1536_vm14, %vm1336_vm2  ;;  %vm373_vm2 = vcmp.eq.f32.partialorder %v1075_v38, inf  ;;  %vm1543_vm14 = vcmp.gt.f32.partialorder %v906_v22, %v832_v30 }
  0xd0   :  { %vm1415_vm10 = vmand %vm1262_vm3, %vm1539_vm0  ;;  %v374_v34 = vsel %vm373_vm2, %v1075_v38, %v372_v61  ;;  %vm385_vm3 = vcmp.eq.f32.partialorder %v1094_v15, inf  ;;  %vm443_vm0 = vcmp.eq.f32.partialorder %v1064_v5, inf  ;;  %vm1548_vm2 = vcmp.lt.f32.partialorder %v834_v31, %v1111_v12 }
  0xd1   :  { %v1541_v0 = vsel %vm1415_vm10, 4294967295, %v1540_v0  ;;  %vm330_vm15 = vmxor %vm1542_vm11, %vm328_vm9  ;;  %vm1544_vm9 = vcmp.eq.f32.partialorder %v933_v56, 0.0  ;;  %vm1545_vm11 = vcmp.lt.f32.partialorder %v830_v29, %v1108_v11  ;;  %v444_v30 = vsel %vm443_vm0, %v1064_v5, %v442_v9 }
  0xd2   :  { %vm331_vm12 = vmxor %vm1543_vm14, %vm329_vm7  ;;  %v319_v28 = vsel %vm1544_vm9, %v318_v46, %v316_v36  ;;  %vm455_vm7 = vcmp.eq.f32.partialorder %v1066_v8, inf  ;;  %v377_v56 = vsel %vm375_vm1, %v376_v40, %v374_v34  ;;  %v388_v29 = vand.u32 2147483648, %v1094_v15 }
  0xd3   :  { %vm1436_vm10 = vmand %vm330_vm15, %vm1545_vm11  ;;  %v446_v38 = vand.u32 2147483648, %v1064_v5  ;;  %v456_v11 = vsel %vm455_vm7, %v1066_v8, %v454_v25  ;;  %v386_v17 = vsel %vm385_vm3, %v1094_v15, %v384_v13  ;;  %vm387_vm0 = vcmp.eq.f32.partialorder %v1094_v15, 0.0 }
  0xd4   :  { %vm1446_vm14 = vmand %vm331_vm12, %vm1548_vm2  ;;  %vm445_vm12 = vcmp.eq.f32.partialorder %v1064_v5, 0.0  ;;  %v458_v31 = vand.u32 2147483648, %v1066_v8  ;;  %v321_v12 = vadd.f32 %v319_v28, %v251_v3  ;;  %v389_v21 = vsel %vm387_vm0, %v388_v29, %v386_v17 }
  0xd5   :  { %vm346_vm15 = vmxor %vm1374_vm4, %vm1436_vm10  ;;  %v447_v54 = vsel %vm445_vm12, %v446_v38, %v444_v30  ;;  %vm457_vm9 = vcmp.eq.f32.partialorder %v1066_v8, 0.0  ;;  %v390_v23 = vadd.f32 %v377_v56, %v320_v26 }
  0xd6   :  { %vm347_vm1 = vmxor %vm1402_vm6, %vm1446_vm14  ;;  %v459_v10 = vsel %vm457_vm9, %v458_v31, %v456_v11  ;;  %v391_v15 = vadd.f32 %v389_v21, %v321_v12  ;;  %vm1551_vm6 = vnez %v1541_v0 }
  0xd7   :  { %vm416_vm4 = vmxor %vm346_vm15, %vm1349_vm5  ;;  %v460_v5 = vadd.f32 %v447_v54, %v390_v23 }
  0xd8   :  { %vm417_vm10 = vmxor %vm347_vm1, %vm1363_vm13  ;;  %v461_v24 = vadd.f32 %v459_v10, %v391_v15 }
  0xd9   :  { %vm486_vm3 = vmxor %vm416_vm4, %vm1391_vm8 }
  0xda   :  { %vm487_vm11 = vmxor %vm417_vm10, %vm1551_vm6  ;;  %v488_v60 = vsel %vm486_vm3, 1.0, %v769_v33 }
  0xdb   :  { %v489_v8 = vsel %vm487_vm11, 1.0, %v769_v33  ;;  %v490_v59 = vmul.f32 %v488_v60, %v460_v5 }
  0xdc   :  { %v491_v62 = vmul.f32 %v489_v8, %v461_v24 }
  0xdd   :  { %v552_v46 = vmul.f32 -0.03125, %v490_v59 }
  0xde   :  { %v553_v43 = vmul.f32 -0.03125, %v491_v62 }
  0xdf   :  { %v496_v7 = vmul.f32 1.442695, %v552_v46 }
  0xe0   :  { %v498_v4 = vmul.f32 1.442695, %v553_v43 }
  0xe1   :  { %632 = vpow2.f32 %v496_v7 }
  0xe2   :  { %634 = vpow2.f32 %v498_v4 }
  0xe7   :  { %v633_v37 = vpop.eup %632 }
  0xe8   :  { %v635_v47 = vpop.eup %634  ;;  %v500_v50 = vadd.f32 1.0, %v633_v37 }
  0xe9   :  { %v501_v1 = vadd.f32 1.0, %v635_v47 }
  0xea   :  { %636 = vrcp.f32 %v500_v50  ;;  %v513_v35 = vand.u32 2147483648, %v500_v50  ;;  %v511_v58 = vand.u32 2147483647, %v500_v50  ;;  %vm507_vm8 = vweird.f32 %v500_v50 }
  0xeb   :  { %638 = vrcp.f32 %v501_v1  ;;  %v528_v44 = vand.u32 2147483648, %v501_v1  ;;  %v526_v51 = vand.u32 2147483647, %v501_v1  ;;  %vm522_vm2 = vweird.f32 %v501_v1 }
  0xec   :  { %v514_v14 = vor.u32 1.1754944e-38, %v513_v35  ;;  %vm512_vm14 = vcmp.eq.f32.partialorder %v511_v58, 8.507059e+37 }
  0xed   :  { %v529_v2 = vor.u32 1.1754944e-38, %v528_v44  ;;  %vm527_vm0 = vcmp.eq.f32.partialorder %v526_v51, 8.507059e+37 }
  0xf0   :  { %v637_v53 = vpop.eup %636 }
  0xf1   :  { %v639_v45 = vpop.eup %638  ;;  %v503_v18 = vmul.f32 %v637_v53, %v500_v50  ;;  %vm508_vm13 = vweird.f32 %v637_v53 }
  0xf2   :  { %v518_v32 = vmul.f32 %v639_v45, %v501_v1  ;;  %vm523_vm5 = vweird.f32 %v639_v45  ;;  %vm509_vm7 = vmor %vm507_vm8, %vm508_vm13 }
  0xf3   :  { %v504_v20 = vsub.f32 1.0, %v503_v18  ;;  %vm524_vm15 = vmor %vm522_vm2, %vm523_vm5 }
  0xf4   :  { %v519_v6 = vsub.f32 1.0, %v518_v32 }
  0xf5   :  { %v505_v39 = vmul.f32 %v637_v53, %v504_v20 }
  0xf6   :  { %v520_v16 = vmul.f32 %v639_v45, %v519_v6 }
  0xf7   :  { %v506_v57 = vadd.f32 %v637_v53, %v505_v39 }
  0xf8   :  { %v521_v3 = vadd.f32 %v639_v45, %v520_v16 }
  0xf9   :  { %v510_v19 = vsel %vm509_vm7, %v637_v53, %v506_v57 }
  0xfa   :  { %v515_v42 = vsel %vm512_vm14, %v514_v14, %v510_v19  ;;  %v525_v63 = vsel %vm524_vm15, %v639_v45, %v521_v3 }
  0xfb   :  { %v530_v55 = vsel %vm527_vm0, %v529_v2, %v525_v63  ;;  %532 = vst [vmem:[#allocation8] sm:$0xff] %v515_v42 }
  0xfc   :  { %533 = vst [vmem:[#allocation8 + $0x8] sm:$0xff] %v530_v55 }
  0xfd   :  { %544 = dma.vmem_to_hbm [thread:$0]  %s540_s2, 256, %s542_s28, [#allocation4]  }
  0xfe   :  { %740 = dma.done.wait [#allocation4], 256  }
  0xff   :  { %741 = vsyncadd [#allocation4], 4294967040 }
 0x100   :  { %549 = vsyncpa [#allocation3], 1 }
 0x101   :  { %550 = vsyncpa [#allocation6], 1 }
 0x102   :  { %551 = vsyncpa [#allocation4], 1 }

</bundles_post_ra>
